<compile_context>
chip_gen: v5e
topology: v5e:2x2
jax: 0.10.0
libtpu: 0.0.40
codegen_flags: <defaults>
</compile_context>

<pallas_src>
import functools

import jax
import jax.numpy as jnp
import numpy as np
from jax.experimental import pallas as pl
from jax.experimental.pallas import tpu as pltpu


# ----------------------------------------------------------------------------
# pin pltpu.roll's rotation direction with a 1-vreg probe so the asymmetric
# (1,3)/(3,1) conv taps are robust to either sign convention of the rotate.
# ----------------------------------------------------------------------------
_ROLL_SIGN = None


def _get_roll_sign():
    global _ROLL_SIGN
    if _ROLL_SIGN is None:
        def probe(x_ref, o_ref):
            o_ref[...] = pltpu.roll(x_ref[...], 1, 1)

        x = jnp.arange(8 * 128, dtype=jnp.float32).reshape(8, 128)
        y = pl.pallas_call(
            probe, out_shape=jax.ShapeDtypeStruct((8, 128), jnp.float32))(x)
        # np.roll convention (elements move to higher index): y[0, 1] == x[0, 0]
        _ROLL_SIGN = 1 if float(np.asarray(jax.device_get(y))[0, 1]) == 0.0 else -1
    return _ROLL_SIGN


# ----------------------------------------------------------------------------
# the kernel: Nb batch elements per grid step, channels-on-sublanes layout
# ----------------------------------------------------------------------------
def mlsp_kernel(H, W, Nb, roll_sign,
                x_ref, wcat_ref, b12_ref, b3_ref, kcat_ref, b21_ref, b22_ref,
                wf1_ref, bf1_ref, wf2_ref, bf2_ref, wf3_ref, bf3_ref,
                out_ref):
    HW = H * W
    P = Nb * HW
    M = b3_ref.shape[0]          # middle_channel
    M2 = b21_ref.shape[0]        # middle_channel // 2
    f32 = jnp.float32
    wdt = wcat_ref.dtype
    relu = lambda v: jnp.maximum(v, 0.0)

    # --- spatial-index masks, built once from one (1, P) iota (lane axis) ----
    pos = jax.lax.broadcasted_iota(jnp.int32, (1, P), 1)
    w_i = pos % W
    h_i = (pos // W) % H
    not_l = w_i != 0
    not_r = w_i != (W - 1)
    not_t = h_i != 0
    not_b = h_i != (H - 1)
    interior = not_l & not_r & not_t & not_b

    def rolled(v, s):
        # out[:, p] = v[:, p - s]  (circular over the P lane axis; wrap rows
        # are always killed by the masks above, incl. cross-sample wrap)
        return pltpu.roll(v, (roll_sign * s) % P, 1)

    # --- per-sample GAP partial sums (reduce each branch eagerly) ------------
    if Nb == 1:
        def gap(f):                                  # (C, P) -> (C, 1)
            return jnp.sum(f, axis=1, keepdims=True)
    else:
        smp = jax.lax.broadcasted_iota(jnp.int32, (P, Nb), 0) // HW
        col = jax.lax.broadcasted_iota(jnp.int32, (P, Nb), 1)
        sel = (smp == col).astype(f32)               # (P, Nb) one-hot selector

        def gap(f):                                  # (C, P) -> (C, Nb)
            return jnp.dot(f, sel, preferred_element_type=f32)

    # --- fused 1x1 convs: [batch1 | batch2 | batch3] in one MXU matmul -------
    xc = jnp.dot(wcat_ref[...], x_ref[...],
                 preferred_element_type=f32)          # (3M, P)
    f12 = relu(xc[:2 * M, :] + b12_ref[...])          # batch1 | batch2
    xm = xc[2 * M:, :]                                # batch3 conv, bias later

    s1 = gap(f12[:M, :])                              # batch1 -> GAP now
    f2 = f12[M:, :]                                   # batch2 feeds the taps

    # --- batch3: separable 3x3 mean (lane rolls) -> mask -> bias -> ReLU -----
    rh = xm + rolled(xm, 1) + rolled(xm, -1)
    rv = rh + rolled(rh, W) + rolled(rh, -W)
    f3 = relu(jnp.where(interior, rv * (1.0 / 9.0), 0.0) + b3_ref[...])
    s3 = gap(f3)

    # --- batch2_1 (1x3) + batch2_2 (3x1): all six taps in one MXU matmul -----
    taps = jnp.dot(kcat_ref[...], f2.astype(wdt),
                   preferred_element_type=f32)        # (6*M2, P)
    # rows: [0:M2]=w-1 tap, [M2:2M2]=w tap, [2M2:3M2]=w+1 tap,
    #       [3M2:4M2]=h-1 tap, [4M2:5M2]=h tap, [5M2:6M2]=h+1 tap
    f21 = relu(taps[M2:2 * M2, :]
               + jnp.where(not_l, rolled(taps[:M2, :], 1), 0.0)
               + jnp.where(not_r, rolled(taps[2 * M2:3 * M2, :], -1), 0.0)
               + b21_ref[...])
    s21 = gap(f21)
    f22 = relu(taps[4 * M2:5 * M2, :]
               + jnp.where(not_t, rolled(taps[3 * M2:4 * M2, :], W), 0.0)
               + jnp.where(not_b, rolled(taps[5 * M2:6 * M2, :], -W), 0.0)
               + b22_ref[...])
    s22 = gap(f22)

    # --- fusion GAP vector (3M, Nb) + FC stack (BN fused, Dropout=identity) --
    g = jnp.concatenate([s1, s21, s22, s3], axis=0) * (1.0 / HW)
    h1 = relu(jnp.dot(wf1_ref[...], g.astype(wdt),
                      preferred_element_type=f32) + bf1_ref[...])
    h2 = relu(jnp.dot(wf2_ref[...], h1.astype(wdt),
                      preferred_element_type=f32) + bf2_ref[...])
    h3 = relu(jnp.dot(wf3_ref[...], h2.astype(wdt),
                      preferred_element_type=f32) + bf3_ref[...])

    # --- softmax over the channel (sublane) axis ------------------------------
    e = jnp.exp(h3 - jnp.max(h3, axis=0, keepdims=True))
    inv = pl.reciprocal(jnp.sum(e, axis=0, keepdims=True), approx=True)
    out_ref[0] = (e * inv).astype(out_ref.dtype)      # (out_ch, Nb)


# ----------------------------------------------------------------------------
# wrapper
# ----------------------------------------------------------------------------
def _prepare_params(params, matmul_dtype):
    (w1, b1, w2, b2, k21, b21, k22, b22, w3, b3,
     wf1, bf1, wf2, bf2, wf3, bf3) = params
    f32 = jnp.float32
    wcat = jnp.concatenate([w1, w2, w3], axis=1).T.astype(matmul_dtype)   # (3M, Cin)
    b12 = jnp.concatenate([b1, b2], axis=1).T.astype(f32)                 # (2M, 1)
    b3c = b3.T.astype(f32)                                                # (M, 1)
    kcat = jnp.concatenate([k21[0], k21[1], k21[2],
                            k22[0], k22[1], k22[2]],
                           axis=1).T.astype(matmul_dtype)                 # (6*M2, M)
    return (wcat, b12, b3c, kcat, b21.T.astype(f32), b22.T.astype(f32),
            wf1.T.astype(matmul_dtype), bf1.T.astype(f32),
            wf2.T.astype(matmul_dtype), bf2.T.astype(f32),
            wf3.T.astype(matmul_dtype), bf3.T.astype(f32))


def mlsp_forward(x_nchw, params, *, samples_per_step=None,
                 matmul_dtype=jnp.float32):
    """matmul_dtype=jnp.bfloat16 halves DMA/MXU input width on v6e/v7x
    (accumulation stays f32); default f32 keeps bit-tight numerics."""
    N, Cin, H, W = x_nchw.shape
    HW = H * W
    if samples_per_step is None:
        # fold samples per grid step but keep >=2 steps for even N (v7x megacore)
        samples_per_step = (N // 2) if (N % 2 == 0 and N >= 2) else 1
    assert N % samples_per_step == 0
    Nb = samples_per_step
    num_steps = N // Nb
    P = Nb * HW

    # NCHW -> channels-on-sublanes / pixels-on-lanes, samples stacked on lanes
    x_t = jnp.transpose(x_nchw, (1, 0, 2, 3)).reshape(Cin, N * HW)
    x_t = x_t.astype(matmul_dtype)

    w = _prepare_params(params, matmul_dtype)
    out_ch = w[-2].shape[0]                     # wf3_t is (out_ch, D2)
    roll_sign = _get_roll_sign()

    def full_spec(p):
        return pl.BlockSpec(p.shape, lambda n, _nd=p.ndim: (0,) * _nd)

    grid_spec = pltpu.PrefetchScalarGridSpec(
        num_scalar_prefetch=0,
        grid=(num_steps,),
        in_specs=[pl.BlockSpec((Cin, P), lambda n: (0, n))]
                 + [full_spec(p) for p in w],
        out_specs=pl.BlockSpec((1, out_ch, Nb), lambda n: (n, 0, 0)),
    )
    # NOTE: for production Cin (thousands) on v7x (64 MiB VMEM) add a Cin-tiling
    # grid axis or a pltpu.CompilerParams(vmem_limit_bytes=...) guard; at the
    # sizes used here the (Cin, P) block is a few KiB.
    out3 = pl.pallas_call(
        functools.partial(mlsp_kernel, H, W, Nb, roll_sign),
        out_shape=jax.ShapeDtypeStruct((num_steps, out_ch, Nb), jnp.float32),
        grid_spec=grid_spec,
        compiler_params=pltpu.CompilerParams(
            dimension_semantics=("parallel",)),
    )(x_t, *w)
    return jnp.transpose(out3, (0, 2, 1)).reshape(N, out_ch)


# ----------------------------------------------------------------------------
# deterministic synthetic parameters (Conv/Linear + BatchNorm fused, eval mode)
# ----------------------------------------------------------------------------
def fused_affine(key, cin, cout, taps=1):
    kw, kb, kg, kbe, km, kv = jax.random.split(key, 6)
    shape = (cin, cout) if taps == 1 else (taps, cin, cout)
    w = 0.1 * jax.random.normal(kw, shape, jnp.float32)
    b = 0.1 * jax.random.normal(kb, (cout,), jnp.float32)
    gamma = 1.0 + 0.1 * jax.random.normal(kg, (cout,), jnp.float32)
    beta = 0.1 * jax.random.normal(kbe, (cout,), jnp.float32)
    mean = 0.1 * jax.random.normal(km, (cout,), jnp.float32)
    var = jax.random.uniform(kv, (cout,), jnp.float32, 0.5, 1.5)
    s = gamma * jax.lax.rsqrt(var + 1e-5)
    w_eff = (w * s).astype(jnp.float32)                     # scale over out dim
    b_eff = ((b - mean) * s + beta).reshape(1, cout).astype(jnp.float32)
    return w_eff, b_eff


def init_params(key, input_channel, middle_channel, out_channel):
    M = middle_channel
    M2 = M // 2
    D1 = int(M * 1.5)
    D2 = int(M * 3 / 8)
    ks = jax.random.split(key, 8)
    w1, b1 = fused_affine(ks[0], input_channel, M)            # batch1
    w2, b2 = fused_affine(ks[1], input_channel, M)            # batch2
    k21, b21 = fused_affine(ks[2], M, M2, taps=3)             # batch2_1 (1x3)
    k22, b22 = fused_affine(ks[3], M, M2, taps=3)             # batch2_2 (3x1)
    w3, b3 = fused_affine(ks[4], input_channel, M)            # batch3
    wf1, bf1 = fused_affine(ks[5], 3 * M, D1)                 # fc1
    wf2, bf2 = fused_affine(ks[6], D1, D2)                    # fc2
    wf3, bf3 = fused_affine(ks[7], D2, out_channel)           # fc3
    return (w1, b1, w2, b2, k21, b21, k22, b22, w3, b3,
            wf1, bf1, wf2, bf2, wf3, bf3)


# ----------------------------------------------------------------------------
# pure-JAX reference (lax convs) for a sanity check
# ----------------------------------------------------------------------------
def mlsp_reference(x_nchw, params):
    (w1, b1, w2, b2, k21, b21, k22, b22, w3, b3,
     wf1, bf1, wf2, bf2, wf3, bf3) = params
    x = jnp.transpose(x_nchw, (0, 2, 3, 1)).astype(jnp.float32)      # NHWC
    dn = ('NHWC', 'HWIO', 'NHWC')

    def conv(inp, k, pad):
        return jax.lax.conv_general_dilated(inp, k, (1, 1), pad,
                                            dimension_numbers=dn)

    relu = lambda v: jnp.maximum(v, 0.0)
    f1 = relu(conv(x, w1[None, None], [(0, 0), (0, 0)]) + b1)
    f2 = relu(conv(x, w2[None, None], [(0, 0), (0, 0)]) + b2)
    f21 = relu(conv(f2, k21[None], [(0, 0), (1, 1)]) + b21)
    f22 = relu(conv(f2, k22[:, None], [(1, 1), (0, 0)]) + b22)
    pooled = jax.lax.reduce_window(x, 0.0, jax.lax.add,
                                   (1, 3, 3, 1), (1, 1, 1, 1), 'VALID') / 9.0
    f3 = relu(conv(pooled, w3[None, None], [(1, 1), (1, 1)]) + b3)
    fusion = jnp.concatenate([f1, f21, f22, f3], axis=-1)
    g = jnp.mean(fusion, axis=(1, 2))
    h1 = relu(g @ wf1 + bf1)
    h2 = relu(h1 @ wf2 + bf2)
    h3 = relu(h2 @ wf3 + bf3)
    return jax.nn.softmax(h3, axis=1)


# ----------------------------------------------------------------------------
if __name__ == "__main__":
    input_channel, middle_channel, out_channel = 4, 32, 16
    N, H, W = 2, 16, 16

    root = jax.random.PRNGKey(0)
    k_x, k_p = jax.random.split(root)
    x = jax.random.normal(k_x, (N, input_channel, H, W), jnp.float32)   # NCHW
    params = init_params(k_p, input_channel, middle_channel, out_channel)

    out = jax.block_until_ready(mlsp_forward(x, params))
    ref = jax.block_until_ready(mlsp_reference(x, params))

    assert out.shape == (N, out_channel)
    np.testing.assert_allclose(np.asarray(jnp.sum(out, axis=1)), 1.0,
                               rtol=0, atol=2e-3)
    np.testing.assert_allclose(np.asarray(out), np.asarray(ref),
                               rtol=5e-2, atol=5e-3)
    print("KERNEL_OK")
</pallas_src>

<mosaic_0001>
module attributes {stable_mosaic.version = 11 : i64} {
  func.func @probe(%arg0: memref<8x128xf32, #tpu.memory_space<vmem>>, %arg1: memref<8x128xf32, #tpu.memory_space<vmem>>) attributes {dimension_semantics = [], scalar_prefetch = 0 : i64, scratch_operands = 0 : i64, tpu.core_type = #tpu.core_type<tc>} {
    %c0 = arith.constant 0 : index
    %c0_0 = arith.constant 0 : index
    %0 = vector.load %arg0[%c0, %c0_0] : memref<8x128xf32, #tpu.memory_space<vmem>>, vector<8x128xf32>
    %c1_i32 = arith.constant 1 : i32
    %1 = tpu.dynamic_rotate %0 by %c1_i32 dim 1 : vector<8x128xf32>, i32 -> vector<8x128xf32>
    %c0_1 = arith.constant 0 : index
    %c0_2 = arith.constant 0 : index
    %2 = vector.load %arg1[%c0_1, %c0_2] : memref<8x128xf32, #tpu.memory_space<vmem>>, vector<8x128xf32>
    tpu.vector_store %arg1[%c0_1, %c0_2], %1 {strides = array<i32>} : memref<8x128xf32, #tpu.memory_space<vmem>>, vector<8x128xf32>,
    return
  }
}

</mosaic_0001>

<bundles_post_ra>
// kernel: tpu_custom_call.1
= control target key start
LH: loop header
LB: loop body
LE: loop exit
PB: predicated region body
PF: predicated region fallthrough
CT: control target
= control target key end

     0   :  { %6 = vsyncpa [#allocation3], 0  ;;  %s118_s0 = inlined_call_operand.hbm [shape: f32[8,128], index: 0, kind: input, shape index: {}]   ;;  %s119_s1 = inlined_call_operand.hbm [shape: f32[8,128], index: 1, kind: output, shape index: {}]  }
   0x1   :  { %7 = vsyncpa [#allocation4], 0  ;;  %s13_s8 = sshll.u32 %s118_s0, 4  ;;  %s99_s9 = smov [#allocation2]   ;;  %s14_s8 = int_to_ptr.hbm [resolvable:$true] %s13_s8 }
   0x2   :  { %s15_s10 = sshll.u32 %s99_s9, 4  ;;  %s16_s10 = int_to_ptr.vmem [resolvable:$true] %s15_s10 }
   0x3   :  { %18 = dma.hbm_to_vmem [thread:$0]  %s14_s8, 128, %s16_s10, [#allocation3]  }
   0x4   :  { %95 = dma.done.wait [#allocation3], 128  }
   0x5   :  { %96 = vsyncadd [#allocation3], 4294967168  ;;  %v23_v0 = vld [vmem:[#allocation2] sm:$0xff]  ;;  %s100_s11 = smov 1   ;;  %s101_s12 = smov [#allocation5]  }
   0x6   :  { %24 = vrot.lane.b32.xlu0 %v23_v0, %s100_s11  ;;  %s32_s13 = sshll.u32 %s101_s12, 4  ;;  %s34_s16 = sshll.u32 %s119_s1, 4  ;;  %s33_s13 = int_to_ptr.vmem [resolvable:$true] %s32_s13  ;;  %s35_s16 = int_to_ptr.hbm [resolvable:$true] %s34_s16 }
  0x78   :  { %v25_v1 = vpop.permute.xlu0 %24 }
  0x79   :  { %26 = vst [vmem:[#allocation5] sm:$0xff] %v25_v1 }
  0x7a   :  { %37 = dma.vmem_to_hbm [thread:$0]  %s33_s13, 128, %s35_s16, [#allocation4]  }
  0x7b   :  { %97 = dma.done.wait [#allocation4], 128  }
  0x7c   :  { %98 = vsyncadd [#allocation4], 4294967168 }
  0x7d   :  { %42 = vsyncpa [#allocation3], 1 }
  0x7e   :  { %43 = vsyncpa [#allocation4], 1 }

</bundles_post_ra>
